<compile_context>
chip_gen: v7x
topology: tpu7x:2x2x1
jax: 0.10.0
libtpu: 0.0.40
codegen_flags: <defaults>
</compile_context>

<pallas_src>
import jax
import jax.numpy as jnp
from jax import lax
from jax.experimental import pallas as pl
from jax.experimental.pallas import tpu as pltpu

_EPS = 1e-8  # F.cosine_similarity default eps


def _round_up(x, m):
    return ((x + m - 1) // m) * m


def _protonet_kernel(labels_ref, support_ref, query_ref, out_ref, proto_ref):
    # ---- prototypes: computed once, reused for every query tile ------------
    # NOTE: this persistent-scratch pattern requires the Q grid axis to be
    # "arbitrary" (sequential); with "parallel" megacore sharding the second
    # core would never see program_id==0.
    @pl.when(pl.program_id(0) == 0)
    def _():
        s = support_ref[...]                                  # (N, D) input dtype
        labels = labels_ref[...]                              # (1, N) int32
        n = s.shape[0]
        c = out_ref.shape[1]

        # one-hot built directly as (C, N): no transpose needed for the matmul
        class_ids = lax.broadcasted_iota(jnp.int32, (c, n), 0)        # (C, N)
        onehot = (class_ids == labels).astype(s.dtype)                # (C, N)

        proto_sum = jnp.dot(onehot, s,
                            preferred_element_type=jnp.float32)       # (C, D) f32
        counts = jnp.sum(onehot.astype(jnp.float32), axis=1,
                         keepdims=True)                               # (C, 1)
        # guard against an empty class (counts==0) -> zero prototype instead of NaN
        inv_counts = pl.reciprocal(jnp.maximum(counts, 1.0))          # (C, 1)
        protos = proto_sum * inv_counts                               # (C, D)

        # fold torch-style eps clamp into the squared norm and use rsqrt (EUP):
        # max(sqrt(x), eps) == sqrt(max(x, eps^2))
        p_sq = jnp.sum(protos * protos, axis=-1, keepdims=True)       # (C, 1)
        inv_p = lax.rsqrt(jnp.maximum(p_sq, _EPS * _EPS))             # (C, 1)
        proto_ref[...] = protos * inv_p                               # unit-norm protos

    # ---- per-tile query work ------------------------------------------------
    q = query_ref[...].astype(jnp.float32)                            # (TQ, D)
    q_sq = jnp.sum(q * q, axis=-1, keepdims=True)                     # (TQ, 1)
    inv_q = lax.rsqrt(jnp.maximum(q_sq, _EPS * _EPS))                 # (TQ, 1)

    # contract last dims of q and the normalized prototypes (no protos.T)
    dots = lax.dot_general(q, proto_ref[...],
                           dimension_numbers=(((1,), (1,)), ((), ())),
                           preferred_element_type=jnp.float32)        # (TQ, C)
    sim = dots * inv_q                                                # cosine sim

    # log_softmax over the class axis
    m = jnp.max(sim, axis=-1, keepdims=True)
    z = sim - m
    lse = jnp.log(jnp.sum(jnp.exp(z), axis=-1, keepdims=True))
    out_ref[...] = (z - lse).astype(out_ref.dtype)


def proto_net_forward(support_set, support_labels, query_set, num_classes,
                      *, max_q_tile=512):
    """support_set: (N, D), support_labels: (N,) int32 in [0, num_classes),
       query_set: (Q, D) or (Q, 1, D).  Returns (Q, num_classes) f32 log-probs."""
    if query_set.ndim == 3:
        query_set = query_set.reshape(query_set.shape[0], query_set.shape[-1])
    n, d = support_set.shape
    q = query_set.shape[0]
    labels = support_labels.astype(jnp.int32).reshape(1, n)   # lane-dense labels

    # query tile: largest multiple of 8 up to max_q_tile; pad Q so the grid divides
    tq = min(max_q_tile, _round_up(q, 8))
    q_pad = _round_up(q, tq)
    if q_pad != q:
        query_set = jnp.pad(query_set, ((0, q_pad - q), (0, 0)))
    grid = (q_pad // tq,)

    # TODO(synk): for production Q with tiny C, pad the class axis to 128 for
    # lane-dense (unmasked) output stores; kept (Q, C) here to preserve the
    # module's output layout at small shapes.
    out = pl.pallas_call(
        _protonet_kernel,
        out_shape=jax.ShapeDtypeStruct((q_pad, num_classes), jnp.float32),
        grid=grid,
        in_specs=[
            pl.BlockSpec((1, n), lambda i: (0, 0)),      # labels, resident
            pl.BlockSpec((n, d), lambda i: (0, 0)),      # support, resident
            pl.BlockSpec((tq, d), lambda i: (i, 0)),     # query tile (pipelined)
        ],
        out_specs=pl.BlockSpec((tq, num_classes), lambda i: (i, 0)),
        scratch_shapes=[pltpu.VMEM((num_classes, d), jnp.float32)],  # unit-norm protos
        compiler_params=pltpu.CompilerParams(
            # "arbitrary": prototype scratch is computed at i==0 and reused.
            dimension_semantics=("arbitrary",),
            vmem_limit_bytes=32 * 1024 * 1024,  # raise v5e's 16 MiB default; safe on v6e/v7x
        ),
    )(labels, support_set, query_set)
    return out[:q]


def _reference(support_set, support_labels, query_set, num_classes):
    # pure-JAX reference mirroring the PyTorch module
    protos = jnp.stack([
        jnp.mean(support_set[support_labels == c], axis=0)
        for c in range(num_classes)
    ])
    qn = jnp.maximum(jnp.linalg.norm(query_set, axis=-1, keepdims=True), _EPS)
    pn = jnp.maximum(jnp.linalg.norm(protos, axis=-1, keepdims=True), _EPS)
    sim = (query_set @ protos.T) / (qn * pn.T)
    return jax.nn.log_softmax(sim, axis=-1)


if __name__ == "__main__":
    key = jax.random.PRNGKey(0)
    k1, k2 = jax.random.split(key)

    features_dim = 32    # ProtoNet(features_dim)
    num_classes = 4
    n_support = 8        # 2 shots per class
    n_query = 8

    support_set = jax.random.normal(k1, (n_support, features_dim), dtype=jnp.float32)
    support_labels = jnp.arange(n_support, dtype=jnp.int32) % num_classes  # covers 0..C-1
    query_set = jax.random.normal(k2, (n_query, 1, features_dim), dtype=jnp.float32)

    log_p_y = proto_net_forward(support_set, support_labels, query_set, num_classes)
    log_p_y = jax.block_until_ready(log_p_y)

    ref = _reference(support_set, support_labels,
                     query_set.reshape(n_query, features_dim), num_classes)
    assert log_p_y.shape == (n_query, num_classes)
    assert jnp.allclose(log_p_y, ref, atol=2e-5, rtol=2e-5)

    print("KERNEL_OK")
</pallas_src>

<mosaic_0001>
module attributes {stable_mosaic.version = 11 : i64} {
  func.func @_protonet_kernel(%arg0: i32, %arg1: memref<1x8xi32, #tpu.memory_space<vmem>>, %arg2: memref<8x32xf32, #tpu.memory_space<vmem>>, %arg3: memref<8x32xf32, #tpu.memory_space<vmem>>, %arg4: memref<8x4xf32, #tpu.memory_space<vmem>>, %arg5: memref<4x32xf32, #tpu.memory_space<vmem>>) attributes {dimension_semantics = [#tpu.dimension_semantics<arbitrary>], iteration_bounds = array<i64: 1>, scalar_prefetch = 0 : i64, scratch_operands = 1 : i64, tpu.core_type = #tpu.core_type<tc>, window_params = [{pipeline_mode = #tpu.pipeline_mode<synchronous>, transform_indices = @transform_0, window_bounds = array<i64: 1, 8>}, {pipeline_mode = #tpu.pipeline_mode<synchronous>, transform_indices = @transform_1, window_bounds = array<i64: 8, 32>}, {transform_indices = @transform_2, window_bounds = array<i64: 8, 32>}, {transform_indices = @transform_3, window_bounds = array<i64: 8, 4>}]} {
    %c0_i32 = arith.constant 0 : i32
    %0 = arith.cmpi eq, %arg0, %c0_i32 : i32
    %1 = arith.extui %0 : i1 to i32
    %c0_i32_0 = arith.constant 0 : i32
    %2 = arith.cmpi ne, %1, %c0_i32_0 : i32
    scf.if %2 {
      %c0_10 = arith.constant 0 : index
      %c0_11 = arith.constant 0 : index
      %25 = vector.load %arg2[%c0_10, %c0_11] : memref<8x32xf32, #tpu.memory_space<vmem>>, vector<8x32xf32>
      %c0_12 = arith.constant 0 : index
      %c0_13 = arith.constant 0 : index
      %26 = vector.load %arg1[%c0_12, %c0_13] : memref<1x8xi32, #tpu.memory_space<vmem>>, vector<1x8xi32>
      %27 = tpu.iota {dimensions = array<i32: 0>} : vector<4x8xi32>
      %28 = vector.broadcast %26 : vector<1x8xi32> to vector<4x8xi32>
      %29 = arith.cmpi eq, %27, %28 : vector<4x8xi32>
      %30 = arith.extui %29 : vector<4x8xi1> to vector<4x8xi32>
      %31 = arith.sitofp %30 : vector<4x8xi32> to vector<4x8xf32>
      %cst_14 = arith.constant dense<0.000000e+00> : vector<4x32xf32>
      %32 = tpu.matmul %31, %25, %cst_14 {dimension_numbers = #tpu.dot_dimension_numbers<[1], [0], [0], [1], [0, 0, 1, 1], [], []>} : vector<4x8xf32>, vector<8x32xf32>, vector<4x32xf32> -> vector<4x32xf32>
      %cst_15 = arith.constant dense<0.000000e+00> : vector<4xf32>
      %33 = vector.multi_reduction <add>, %31, %cst_15 [1] : vector<4x8xf32> to vector<4xf32>
      %34 = vector.shape_cast %33 : vector<4xf32> to vector<4x1xf32>
      %cst_16 = arith.constant 1.000000e+00 : f32
      %35 = vector.broadcast %cst_16 : f32 to vector<4x1xf32>
      %36 = arith.maximumf %34, %35 : vector<4x1xf32>
      %37 = tpu.reciprocal %36 : vector<4x1xf32> -> vector<4x1xf32>
      %38 = vector.broadcast %37 : vector<4x1xf32> to vector<4x32xf32>
      %39 = arith.mulf %32, %38 : vector<4x32xf32>
      %40 = arith.mulf %39, %39 : vector<4x32xf32>
      %cst_17 = arith.constant dense<0.000000e+00> : vector<4xf32>
      %41 = vector.multi_reduction <add>, %40, %cst_17 [1] : vector<4x32xf32> to vector<4xf32>
      %42 = vector.shape_cast %41 : vector<4xf32> to vector<4x1xf32>
      %cst_18 = arith.constant 1.000000e-16 : f32
      %43 = vector.broadcast %cst_18 : f32 to vector<4x1xf32>
      %44 = arith.maximumf %42, %43 : vector<4x1xf32>
      %45 = math.rsqrt %44 : vector<4x1xf32>
      %46 = vector.broadcast %45 : vector<4x1xf32> to vector<4x32xf32>
      %47 = arith.mulf %39, %46 : vector<4x32xf32>
      %c0_19 = arith.constant 0 : index
      %c0_20 = arith.constant 0 : index
      %48 = vector.load %arg5[%c0_19, %c0_20] : memref<4x32xf32, #tpu.memory_space<vmem>>, vector<4x32xf32>
      tpu.vector_store %arg5[%c0_19, %c0_20], %47 {strides = array<i32>} : memref<4x32xf32, #tpu.memory_space<vmem>>, vector<4x32xf32>,
    } else {
    }
    %c0 = arith.constant 0 : index
    %c0_1 = arith.constant 0 : index
    %3 = vector.load %arg3[%c0, %c0_1] : memref<8x32xf32, #tpu.memory_space<vmem>>, vector<8x32xf32>
    %4 = arith.mulf %3, %3 : vector<8x32xf32>
    %cst = arith.constant dense<0.000000e+00> : vector<8xf32>
    %5 = vector.multi_reduction <add>, %4, %cst [1] : vector<8x32xf32> to vector<8xf32>
    %6 = vector.shape_cast %5 : vector<8xf32> to vector<8x1xf32>
    %cst_2 = arith.constant 1.000000e-16 : f32
    %7 = vector.broadcast %cst_2 : f32 to vector<8x1xf32>
    %8 = arith.maximumf %6, %7 : vector<8x1xf32>
    %9 = math.rsqrt %8 : vector<8x1xf32>
    %c0_3 = arith.constant 0 : index
    %c0_4 = arith.constant 0 : index
    %10 = vector.load %arg5[%c0_3, %c0_4] : memref<4x32xf32, #tpu.memory_space<vmem>>, vector<4x32xf32>
    %cst_5 = arith.constant dense<0.000000e+00> : vector<8x4xf32>
    %11 = tpu.matmul %3, %10, %cst_5 {dimension_numbers = #tpu.dot_dimension_numbers<[1], [1], [0], [0], [0, 0, 1, 0], [], []>} : vector<8x32xf32>, vector<4x32xf32>, vector<8x4xf32> -> vector<8x4xf32>
    %12 = vector.broadcast %9 : vector<8x1xf32> to vector<8x4xf32>
    %13 = arith.mulf %11, %12 : vector<8x4xf32>
    %cst_6 = arith.constant dense<0xFF800000> : vector<8xf32>
    %14 = vector.multi_reduction <maximumf>, %13, %cst_6 [1] : vector<8x4xf32> to vector<8xf32>
    %15 = vector.shape_cast %14 : vector<8xf32> to vector<8x1xf32>
    %16 = vector.broadcast %15 : vector<8x1xf32> to vector<8x4xf32>
    %17 = arith.subf %13, %16 : vector<8x4xf32>
    %18 = math.exp %17 : vector<8x4xf32>
    %cst_7 = arith.constant dense<0.000000e+00> : vector<8xf32>
    %19 = vector.multi_reduction <add>, %18, %cst_7 [1] : vector<8x4xf32> to vector<8xf32>
    %20 = vector.shape_cast %19 : vector<8xf32> to vector<8x1xf32>
    %21 = math.log %20 : vector<8x1xf32>
    %22 = vector.broadcast %21 : vector<8x1xf32> to vector<8x4xf32>
    %23 = arith.subf %17, %22 : vector<8x4xf32>
    %c0_8 = arith.constant 0 : index
    %c0_9 = arith.constant 0 : index
    %24 = vector.load %arg4[%c0_8, %c0_9] : memref<8x4xf32, #tpu.memory_space<vmem>>, vector<8x4xf32>
    tpu.vector_store %arg4[%c0_8, %c0_9], %23 {strides = array<i32>} : memref<8x4xf32, #tpu.memory_space<vmem>>, vector<8x4xf32>,
    return
  }
  func.func @transform_0(%arg0: i32) -> (i32, i32) {
    %c0_i32 = arith.constant 0 : i32
    %c0_i32_0 = arith.constant 0 : i32
    %c0_i32_1 = arith.constant 0 : i32
    return %c0_i32, %c0_i32_0 : i32, i32
  }
  func.func @transform_1(%arg0: i32) -> (i32, i32) {
    %c0_i32 = arith.constant 0 : i32
    %c0_i32_0 = arith.constant 0 : i32
    %c0_i32_1 = arith.constant 0 : i32
    return %c0_i32, %c0_i32_0 : i32, i32
  }
  func.func @transform_2(%arg0: i32) -> (i32, i32) {
    %c0_i32 = arith.constant 0 : i32
    %c0_i32_0 = arith.constant 0 : i32
    return %arg0, %c0_i32 : i32, i32
  }
  func.func @transform_3(%arg0: i32) -> (i32, i32) {
    %c0_i32 = arith.constant 0 : i32
    %c0_i32_0 = arith.constant 0 : i32
    return %arg0, %c0_i32 : i32, i32
  }
}

</mosaic_0001>

<bundles_post_ra>
// kernel: tpu_custom_call.1
= control target key start
LH: loop header
LB: loop body
LE: loop exit
PB: predicated region body
PF: predicated region fallthrough
CT: control target
= control target key end

     0   :  { %8 = vsyncpa [#allocation4], 0  ;;  %s431_s0 = inlined_call_operand.hbm [shape: s32[1,8], index: 0, kind: input, shape index: {}]   ;;  %s432_s1 = inlined_call_operand.hbm [shape: f32[8,32], index: 1, kind: input, shape index: {}]   ;;  %s433_s2 = inlined_call_operand.hbm [shape: f32[8,32], index: 2, kind: input, shape index: {}]   ;;  %s434_s3 = inlined_call_operand.vmem [shape: f32[8,4], index: 3, kind: output, shape index: {}]  }
   0x1   :  { %9 = vsyncpa [#allocation6], 0  ;;  %s364_s12 = smov [#allocation5]   ;;  %s365_s14 = smov [#allocation3]  }
   0x2   :  { %s26_s13 = sshll.u32 %s364_s12, 4  ;;  %s16_s15 = sshll.u32 %s365_s14, 4  ;;  %s27_s13 = int_to_ptr.vmem [resolvable:$true] %s26_s13  ;;  %s17_s15 = int_to_ptr.vmem [resolvable:$true] %s16_s15 }
   0x3   :  { %s294_s18 = scalar_lea.hbm %s432_s1, 128 }
   0x4   :  { %p295_p0 = scmp.ne.s32.totalorder %s432_s1, %s294_s18  ;;  %p298_p1 = scmp.lt.u32.totalorder %s294_s18, %s432_s1 }
   0x6   :  { %p300_p2 = pnand %p298_p1, %p295_p0 }
   0x8   :  { %303 = shalt.err (!%p300_p2)
}
   0x9   :  { %s304_s23 = scalar_lea.vmem %s27_s13, 128  ;;  %p309_p4 = scmp.lt.s32.totalorder %s27_s13, %s27_s13 }
   0xa   :  { %p305_p3 = scmp.ne.s32.totalorder %s27_s13, %s304_s23  ;;  %p310_p5 = scmp.lt.s32.totalorder %s304_s23, %s304_s23 }
   0xc   :  { %p311_p6 = por %p310_p5, %p309_p4 }
   0xe   :  { %p312_p7 = pnand %p311_p6, %p305_p3 }
  0x10   :  { %315 = shalt.err (!%p312_p7)
}
  0x11   :  { %29 = dma.hbm_to_vmem [thread:$0]  %s432_s1, 128, %s27_s13, [#allocation6]  }
  0x12   :  { %s316_s28 = scalar_lea.hbm %s431_s0, 16 }
  0x13   :  { %p317_p8 = scmp.ne.s32.totalorder %s431_s0, %s316_s28  ;;  %p320_p9 = scmp.lt.u32.totalorder %s316_s28, %s431_s0 }
  0x15   :  { %p322_p10 = pnand %p320_p9, %p317_p8 }
  0x17   :  { %325 = shalt.err (!%p322_p10)
}
  0x18   :  { %s326_s6 = scalar_lea.vmem %s17_s15, 16  ;;  %s330_s7 = scalar_lea.vmem %s17_s15, 32 }
  0x19   :  { %p327_p11 = scmp.ne.s32.totalorder %s17_s15, %s326_s6  ;;  %p331_p12 = scmp.lt.s32.totalorder %s17_s15, %s17_s15 }
  0x1a   :  { %p332_p13 = scmp.lt.s32.totalorder %s330_s7, %s326_s6 }
  0x1c   :  { %p333_p0 = por %p332_p13, %p331_p12 }
  0x1e   :  { %p334_p1 = pnand %p333_p0, %p327_p11 }
  0x20   :  { %337 = shalt.err (!%p334_p1)
}
  0x21   :  { %19 = dma.hbm_to_vmem [thread:$0]  %s431_s0, 16, %s17_s15, [#allocation4]  }
  0x22   :  { %s366_s9 = smov [#allocation7]   ;;  %s338_s13 = scalar_lea.hbm %s433_s2, 128 }
  0x23   :  { %s36_s10 = sshll.u32 %s366_s9, 4  ;;  %p339_p2 = scmp.ne.s32.totalorder %s433_s2, %s338_s13  ;;  %s37_s10 = int_to_ptr.vmem [resolvable:$true] %s36_s10 }
  0x24   :  { %p342_p3 = scmp.lt.u32.totalorder %s338_s13, %s433_s2 }
  0x26   :  { %p344_p4 = pnand %p342_p3, %p339_p2 }
  0x28   :  { %347 = shalt.err (!%p344_p4)
}
  0x29   :  { %s348_s19 = scalar_lea.vmem %s37_s10, 128  ;;  %p353_p6 = scmp.lt.s32.totalorder %s37_s10, %s37_s10 }
  0x2a   :  { %p349_p5 = scmp.ne.s32.totalorder %s37_s10, %s348_s19  ;;  %p354_p7 = scmp.lt.s32.totalorder %s348_s19, %s348_s19 }
  0x2c   :  { %p355_p8 = por %p354_p7, %p353_p6 }
  0x2e   :  { %p356_p9 = pnand %p355_p8, %p349_p5 }
  0x30   :  { %359 = shalt.err (!%p356_p9)
}
  0x31   :  { %39 = dma.hbm_to_vmem [thread:$0]  %s433_s2, 128, %s37_s10, [#allocation6]  }
  0x32   :  { %360 = dma.done.wait [#allocation4], 16  }
  0x33   :  { %361 = vsyncadd [#allocation4], 4294967280 }
  0x34   :  { %362 = dma.done.wait [#allocation6], 256  }
  0x35   :  { %363 = vsyncadd [#allocation6], 4294967040  ;;  %v55_v0 = vlaneseq  ;;  %v367_v1 = vmov 0.0   ;;  %vm368_vm0 = vmmov 0   ;;  %v53_v3 = vld [vmem:[#allocation5] sm:$0xff]  ;;  %vm64_vm1 = vcmask 64512  }
  0x36   :  { %269 = vmatprep.subr.mxu0 %v367_v1  ;;  %271 = vmatprep.mubr.msk.f32.mxu0 %vm368_vm0, %v367_v1  ;;  %v260_v4 = vld [vmem:[#allocation3] ss:$0 sm:$0xff]  ;;  %vm138_vm2 = vcmask 60416   ;;  %vm146_vm4 = vcmask 257024   ;;  %v154_v15 = vld [vmem:[#allocation7] sm:$0xff]  ;;  %vm156_vm5 = vcmask 261120  }
  0x37   :  { %274 = vmatprep.subr.mxu1 %v367_v1  ;;  %276 = vmatprep.mubr.msk.f32.mxu1 %vm368_vm0, %v367_v1  ;;  %v56_v2 = vshrl.u32 %v55_v0, 7  ;;  %v155_v16 = vmul.f32 %v154_v15, %v154_v15  ;;  %vm240_vm6 = vcmask 31744  }
  0x38   :  { %270 = vmatpush3.msra.mxu0 %v53_v3 }
  0x39   :  { %vm61_vm3 = vcmp.eq.s32.totalorder %v56_v2, %v260_v4  ;;  %v157_v17 = vsel %vm156_vm5, %v155_v16, 0.0 }
  0x3a   :  { %v261_v5 = vsel %vm61_vm3, 1.0, %v367_v1  ;;  %158 = vadd.xlane.f32.xlu1 %v157_v17 }
  0x3b   :  { %272 = vmatmul.mubr.msk.f32.vlgmr.msra.gmra.mrb[0].mxu0 %vm64_vm1, %v261_v5  ;;  %v139_v6 = vsel %vm138_vm2, %v261_v5, 0.0 }
  0x3c   :  { %140 = vadd.xlane.f32.xlu0 %v139_v6 }
  0xc7   :  { %v159_v23 = vpop.xlane.xlu1 %158 }
  0xc8   :  { %v160_v24 = vmax.f32 %v159_v23, 1e-16 }
  0xc9   :  { %v141_v7 = vpop.xlane.xlu0 %140 }
  0xca   :  { %v142_v8 = vmax.f32 %v141_v7, 1.0 }
  0xcc   :  { %284 = vrcp.f32 %v142_v8 }
  0xd6   :  { %v285_v9 = vpop.eup %284 }
 0x10e   :  { %v134_v10 = vpop.f32.mrb[0].mxu0 }
 0x10f   :  { %v144_v11 = vmul.f32 %v285_v9, %v134_v10  ;;  %v273_v12 = vpop.f32.mrb[1].mxu0 }
 0x111   :  { %v145_v13 = vmul.f32 %v144_v11, %v144_v11 }
 0x113   :  { %v147_v14 = vsel %vm146_vm4, %v145_v13, 0.0 }
 0x114   :  { %148 = vadd.xlane.f32.xlu0 %v147_v14 }
 0x1a1   :  { %v149_v18 = vpop.xlane.xlu0 %148 }
 0x1a2   :  { %v150_v19 = vmax.f32 %v149_v18, 1e-16 }
 0x1a4   :  { %286 = vrsqrt.f32 %v150_v19 }
 0x1a5   :  { %288 = vrsqrt.f32 %v160_v24 }
 0x1ae   :  { %v287_v20 = vpop.eup %286 }
 0x1af   :  { %v152_v21 = vmul.f32 %v287_v20, %v144_v11  ;;  %v289_v25 = vpop.eup %288 }
 0x1b1   :  { %153 = vst.msk [vmem:[#allocation2] sm:$0xf] %vm146_vm4, %v152_v21 }
 0x1b8   :  { %v162_v22 = vld [vmem:[#allocation2] sm:$0xf] }
 0x1b9   :  { %275 = vmatpush3.xpose.msk.msra.mxu1 %vm156_vm5, %v162_v22 }
 0x1bc   :  { %277 = vmatmul.mubr.msk.f32.vlgmr.msra.gmra.mrb[0].mxu1 %vm156_vm5, %v154_v15 }
 0x28f   :  { %v235_v26 = vpop.f32.mrb[0].mxu1 }
 0x290   :  { %v239_v27 = vmul.f32 %v289_v25, %v235_v26  ;;  %v278_v28 = vpop.f32.mrb[1].mxu1 }
 0x292   :  { %v241_v29 = vsel %vm240_vm6, %v239_v27, -inf }
 0x293   :  { %242 = vmax.xlane.f32.xlu1 %v241_v29 }
 0x320   :  { %v243_v30 = vpop.xlane.xlu1 %242 }
 0x321   :  { %v244_v31 = vsub.f32 %v239_v27, %v243_v30 }
 0x323   :  { %v245_v32 = vmul.f32 1.442695, %v244_v31 }
 0x325   :  { %290 = vpow2.f32 %v245_v32 }
 0x32f   :  { %v291_v33 = vpop.eup %290 }
 0x330   :  { %v247_v34 = vsel %vm240_vm6, %v291_v33, 0.0 }
 0x331   :  { %248 = vadd.xlane.f32.xlu0 %v247_v34 }
 0x3be   :  { %v249_v35 = vpop.xlane.xlu0 %248 }
 0x3bf   :  { %292 = vlog2.f32 %v249_v35 }
 0x3c9   :  { %v293_v36 = vpop.eup %292 }
 0x3ca   :  { %v251_v37 = vmul.f32 0.6931472, %v293_v36 }
 0x3cc   :  { %v252_v38 = vsub.f32 %v244_v31, %v251_v37 }
 0x3ce   :  { %253 = vst.msk [vmem:[%s434_s3] sm:$0xff] %vm240_vm6, %v252_v38 }
 0x3cf   :  { %258 = vsyncpa [#allocation4], 1 }
 0x3d0   :  { %259 = vsyncpa [#allocation6], 1 }

</bundles_post_ra>
